<compile_context>
chip_gen: v7x
topology: tpu7x:2x2x1
jax: 0.10.0
libtpu: 0.0.40
codegen_flags: <defaults>
</compile_context>

<pallas_src>
import functools

import jax
import jax.numpy as jnp
from jax.experimental import pallas as pl
from jax.experimental.pallas import tpu as pltpu


_VMEM = pl.BlockSpec(memory_space=pltpu.MemorySpace.VMEM)
_SMEM = pl.BlockSpec(memory_space=pltpu.MemorySpace.SMEM)


def _round_up(n, m):
    return ((n + m - 1) // m) * m


def _pad2d(a, rows, cols):
    r, c = a.shape
    return jnp.pad(a, ((0, rows - r), (0, cols - c)))


# ----------------------------------------------------------------------------
# Kernel 1: fused impute + shared MLP + classifiers + squared pairwise distance
# ----------------------------------------------------------------------------
def _encode_pair_kernel(xa_ref, xb_ref, gd_ref, inv_na_ref, inv_nb_ref,
                        w1a_ref, w1b_ref, b1_ref, w2_ref, b2_ref,
                        wca_ref, bca_ref, wcb_ref, bcb_ref,
                        impa_ref, impb_ref, pa_ref, pb_ref, d2_ref):
    f32, bf16 = jnp.float32, jnp.bfloat16

    xa = xa_ref[...].astype(bf16)
    xb = xb_ref[...].astype(bf16)
    gd = gd_ref[...].astype(bf16)

    # impute: (x_A @ gene_dist) / norm_B ; (x_B @ gene_dist.T) / norm_A
    # (division realised as multiply by 1/norm, transpose as a contraction)
    imp_a = jnp.dot(xa, gd, preferred_element_type=f32) * inv_nb_ref[...]
    imp_b = jax.lax.dot_general(xb, gd, (((1,), (1,)), ((), ())),
                                preferred_element_type=f32) * inv_na_ref[...]
    impa_ref[...] = imp_a
    impb_ref[...] = imp_b

    # shared MLP layer 1: concat([x, imp]) @ W1 == x @ W1_top + imp @ W1_bot
    w1a = w1a_ref[...].astype(bf16)
    w1b = w1b_ref[...].astype(bf16)
    b1 = b1_ref[...]
    h1a = (jnp.dot(xa, w1a, preferred_element_type=f32)
           + jnp.dot(imp_a.astype(bf16), w1b, preferred_element_type=f32) + b1)
    h1b = (jnp.dot(imp_b.astype(bf16), w1a, preferred_element_type=f32)
           + jnp.dot(xb, w1b, preferred_element_type=f32) + b1)
    h1a = jnp.maximum(h1a, 0.0)
    h1b = jnp.maximum(h1b, 0.0)

    # shared MLP layer 2
    w2 = w2_ref[...].astype(bf16)
    b2 = b2_ref[...]
    emb_a = jnp.maximum(
        jnp.dot(h1a.astype(bf16), w2, preferred_element_type=f32) + b2, 0.0)
    emb_b = jnp.maximum(
        jnp.dot(h1b.astype(bf16), w2, preferred_element_type=f32) + b2, 0.0)

    # classifier heads (lane-padded to 128 output columns -> dense stores)
    pa_ref[...] = (jnp.dot(emb_a.astype(bf16), wca_ref[...].astype(bf16),
                           preferred_element_type=f32) + bca_ref[...])
    pb_ref[...] = (jnp.dot(emb_b.astype(bf16), wcb_ref[...].astype(bf16),
                           preferred_element_type=f32) + bcb_ref[...])

    # squared pairwise distance (sqrt dropped: monotone => identical top-k).
    # Kept in f32 so near-tie neighbour ranking stays stable.
    ab = jax.lax.dot_general(emb_a, emb_b, (((1,), (1,)), ((), ())),
                             preferred_element_type=f32)            # (N_A, N_B)
    a2 = jnp.sum(emb_a * emb_a, axis=1, keepdims=True)              # (N_A, 1)
    eb_sq = emb_b * emb_b
    ones_row = jnp.ones((1, eb_sq.shape[1]), f32)
    b2row = jax.lax.dot_general(ones_row, eb_sq, (((1,), (1,)), ((), ())),
                                preferred_element_type=f32)         # (1, N_B), no XLU transpose
    d2_ref[...] = a2 + b2row - 2.0 * ab


# ----------------------------------------------------------------------------
# Kernel 2: fused embedding_bag(mean) + both MSE losses (scalar in SMEM).
# The neighbour average is realised as a one-hot averaging matrix (k static
# VPU compare/accumulate passes) followed by a single MXU matmul; padded
# sample rows are masked, so the division by the true element count is exact.
# ----------------------------------------------------------------------------
def _bag_mse_kernel(nn_a_ref, nn_b_ref, impa_ref, impb_ref, xa_ref, xb_ref,
                    loss_ref, *, k, na, nb, ga, gb):
    f32 = jnp.float32
    inv_k = 1.0 / float(k)

    def side_loss(nn_ref, src_ref, tgt_ref, n_rows, denom):
        rows_p = tgt_ref.shape[0]        # padded target rows
        src_rows_p = src_ref.shape[0]    # padded source (neighbour-pool) rows

        # one-hot neighbour-count matrix: avg[i, j] = #{m : nn[i, m] == j}
        col_ids = jax.lax.broadcasted_iota(jnp.int32, (rows_p, src_rows_p), 1)
        avg = jnp.zeros((rows_p, src_rows_p), f32)
        for m in range(k):                                   # k is static
            nn_col = nn_ref[:, m:m + 1]                      # (rows_p, 1) int32
            avg = avg + (col_ids == nn_col).astype(f32)

        # mean-of-neighbours as one MXU matmul (f32 for loss accuracy)
        pred = jnp.dot(avg * inv_k, src_ref[...], preferred_element_type=f32)
        diff = pred - tgt_ref[...]

        # mask padded sample rows; padded gene columns are zero in both pred
        # and target already.  Divide by the TRUE (unpadded) element count.
        row_ids = jax.lax.broadcasted_iota(jnp.int32, (rows_p, 1), 0)
        diff = jnp.where(row_ids < n_rows, diff, 0.0)
        return jnp.sum(diff * diff) * (1.0 / denom)

    loss_a = side_loss(nn_a_ref, impb_ref, xa_ref, na, float(na * ga))
    loss_b = side_loss(nn_b_ref, impa_ref, xb_ref, nb, float(nb * gb))
    loss_ref[0] = loss_a + loss_b


# ----------------------------------------------------------------------------
# Parameter construction + forward
# ----------------------------------------------------------------------------
def init_params(key, n_genes_A, n_genes_B, n_classes_A, n_classes_B):
    """torch-nn.Linear-style init; weights stored pre-transposed as (in, out)."""
    def linear(k, fan_in, fan_out):
        k_w, k_b = jax.random.split(k)
        bound = 1.0 / jnp.sqrt(float(fan_in))
        w = jax.random.uniform(k_w, (fan_in, fan_out), jnp.float32, -bound, bound)
        b = jax.random.uniform(k_b, (1, fan_out), jnp.float32, -bound, bound)
        return w, b

    k1, k2, k3, k4 = jax.random.split(key, 4)
    w1, b1 = linear(k1, n_genes_A + n_genes_B, 64)
    w2, b2 = linear(k2, 64, 32)
    wca, bca = linear(k3, 32, n_classes_A)
    wcb, bcb = linear(k4, 32, n_classes_B)
    return dict(w1=w1, b1=b1, w2=w2, b2=b2, wca=wca, bca=bca, wcb=wcb, bcb=bcb)


def tactics_forward(params, gene_dist, x_A, x_B, n_nbrs=20):
    G_A, G_B = gene_dist.shape
    N_A, N_B = x_A.shape[0], x_B.shape[0]
    C_A = params["wca"].shape[1]
    C_B = params["wcb"].shape[1]

    # ---- lane-dense padding: sample rows -> x8, feature/class axes -> x128 --
    N_Ap, N_Bp = _round_up(N_A, 8), _round_up(N_B, 8)
    G_Ap, G_Bp = _round_up(G_A, 128), _round_up(G_B, 128)
    C_p = _round_up(max(C_A, C_B), 128)

    gd_p = _pad2d(gene_dist, G_Ap, G_Bp)
    xa_p = _pad2d(x_A, N_Ap, G_Ap)
    xb_p = _pad2d(x_B, N_Bp, G_Bp)

    # gene_dist normalisers (zero sums -> 1, as in the torch __init__);
    # padded rows/cols sum to 0 and therefore also map to 1 (keeps pads at 0).
    norm_A = gd_p.sum(axis=1)
    norm_A = jnp.where(norm_A == 0, 1.0, norm_A)
    norm_B = gd_p.sum(axis=0)
    norm_B = jnp.where(norm_B == 0, 1.0, norm_B)
    inv_na = (1.0 / norm_A)[None, :]        # (1, G_Ap)
    inv_nb = (1.0 / norm_B)[None, :]        # (1, G_Bp)

    # split + pad shared layer-1 weight: rows [:G_A] hit the A-gene block,
    # rows [G_A:] hit the B-gene block of the concatenated input.
    w1_top = _pad2d(params["w1"][:G_A], G_Ap, 64)
    w1_bot = _pad2d(params["w1"][G_A:], G_Bp, 64)
    wca_p = _pad2d(params["wca"], 32, C_p)
    bca_p = _pad2d(params["bca"], 1, C_p)
    wcb_p = _pad2d(params["wcb"], 32, C_p)
    bcb_p = _pad2d(params["bcb"], 1, C_p)

    enc_inputs = (xa_p, xb_p, gd_p, inv_na, inv_nb, w1_top, w1_bot,
                  params["b1"], params["w2"], params["b2"],
                  wca_p, bca_p, wcb_p, bcb_p)

    enc_flops = 2 * (N_Ap * G_Ap * G_Bp + N_Bp * G_Bp * G_Ap
                     + (N_Ap + N_Bp) * (G_Ap + G_Bp) * 64
                     + (N_Ap + N_Bp) * 64 * 32
                     + (N_Ap + N_Bp) * 32 * C_p
                     + N_Ap * N_Bp * 32)
    enc_out_elems = (N_Ap * G_Bp + N_Bp * G_Ap
                     + (N_Ap + N_Bp) * C_p + N_Ap * N_Bp)
    enc_bytes = 4 * (sum(int(a.size) for a in enc_inputs) + enc_out_elems)

    imp_a, imp_b, preds_a_p, preds_b_p, d2 = pl.pallas_call(
        _encode_pair_kernel,
        in_specs=[_VMEM] * len(enc_inputs),
        out_specs=(_VMEM,) * 5,
        out_shape=(
            jax.ShapeDtypeStruct((N_Ap, G_Bp), jnp.float32),   # x_impute_A
            jax.ShapeDtypeStruct((N_Bp, G_Ap), jnp.float32),   # x_impute_B
            jax.ShapeDtypeStruct((N_Ap, C_p), jnp.float32),    # x_preds_A (padded)
            jax.ShapeDtypeStruct((N_Bp, C_p), jnp.float32),    # x_preds_B (padded)
            jax.ShapeDtypeStruct((N_Ap, N_Bp), jnp.float32),   # squared cdist
        ),
        cost_estimate=pl.CostEstimate(flops=enc_flops, transcendentals=0,
                                      bytes_accessed=enc_bytes),
        compiler_params=pltpu.CompilerParams(vmem_limit_bytes=32 * 1024 * 1024),
    )(*enc_inputs)

    x_preds_A = preds_a_p[:N_A, :C_A]
    x_preds_B = preds_b_p[:N_B, :C_B]

    # top-k nearest neighbours on squared distances (monotone => same ranking)
    # torch.topk(..., largest=False) -> smallest-k; tie order may differ (harmless)
    d2v = d2[:N_A, :N_B]
    k = min(n_nbrs, N_A, N_B)
    nn_A = jax.lax.top_k(-d2v, k)[1].astype(jnp.int32)       # (N_A, k) nbrs in B
    nn_B = jax.lax.top_k(-d2v.T, k)[1].astype(jnp.int32)     # (N_B, k) nbrs in A
    nn_A_p = jnp.pad(nn_A, ((0, N_Ap - N_A), (0, 0)))        # padded rows -> idx 0 (masked)
    nn_B_p = jnp.pad(nn_B, ((0, N_Bp - N_B), (0, 0)))

    loss_flops = (2 * (N_Ap * N_Bp * G_Ap + N_Bp * N_Ap * G_Bp)
                  + 4 * k * N_Ap * N_Bp
                  + 3 * (N_Ap * G_Ap + N_Bp * G_Bp))
    loss_bytes = 4 * int(imp_a.size + imp_b.size + xa_p.size + xb_p.size
                         + nn_A_p.size + nn_B_p.size + 1)

    loss = pl.pallas_call(
        functools.partial(_bag_mse_kernel, k=k, na=N_A, nb=N_B, ga=G_A, gb=G_B),
        in_specs=[_VMEM, _VMEM, _VMEM, _VMEM, _VMEM, _VMEM],
        out_specs=_SMEM,
        out_shape=jax.ShapeDtypeStruct((1,), jnp.float32),
        cost_estimate=pl.CostEstimate(flops=loss_flops, transcendentals=0,
                                      bytes_accessed=loss_bytes),
        compiler_params=pltpu.CompilerParams(vmem_limit_bytes=32 * 1024 * 1024),
    )(nn_A_p, nn_B_p, imp_a, imp_b, xa_p, xb_p)

    return x_preds_A, x_preds_B, loss[0]


# ----------------------------------------------------------------------------
# main
# ----------------------------------------------------------------------------
if __name__ == "__main__":
    key = jax.random.PRNGKey(0)
    k_xa, k_xb, k_gd, k_params = jax.random.split(key, 4)

    # small, forward-consistent shapes
    N_A, N_B = 16, 12                 # cells in dataset A / B
    n_genes_A, n_genes_B = 24, 40
    n_classes_A, n_classes_B = 5, 7

    x_A = jax.random.normal(k_xa, (N_A, n_genes_A), jnp.float32)
    x_B = jax.random.normal(k_xb, (N_B, n_genes_B), jnp.float32)

    gene_dist = jax.random.uniform(k_gd, (n_genes_A, n_genes_B), jnp.float32)
    gene_dist = jnp.where(gene_dist < 0.2, 0.0, gene_dist)   # sparse-ish gene map

    params = init_params(k_params, n_genes_A, n_genes_B,
                         n_classes_A, n_classes_B)

    x_preds_A, x_preds_B, emb_loss = tactics_forward(params, gene_dist, x_A, x_B)
    jax.block_until_ready((x_preds_A, x_preds_B, emb_loss))

    assert x_preds_A.shape == (N_A, n_classes_A)
    assert x_preds_B.shape == (N_B, n_classes_B)
    assert emb_loss.shape == ()
    assert bool(jnp.isfinite(emb_loss))

    print("KERNEL_OK")
</pallas_src>

<mosaic_0001>
module attributes {stable_mosaic.version = 11 : i64} {
  func.func @_encode_pair_kernel(%arg0: memref<16x128xf32, #tpu.memory_space<vmem>>, %arg1: memref<16x128xf32, #tpu.memory_space<vmem>>, %arg2: memref<128x128xf32, #tpu.memory_space<vmem>>, %arg3: memref<1x128xf32, #tpu.memory_space<vmem>>, %arg4: memref<1x128xf32, #tpu.memory_space<vmem>>, %arg5: memref<128x64xf32, #tpu.memory_space<vmem>>, %arg6: memref<128x64xf32, #tpu.memory_space<vmem>>, %arg7: memref<1x64xf32, #tpu.memory_space<vmem>>, %arg8: memref<64x32xf32, #tpu.memory_space<vmem>>, %arg9: memref<1x32xf32, #tpu.memory_space<vmem>>, %arg10: memref<32x128xf32, #tpu.memory_space<vmem>>, %arg11: memref<1x128xf32, #tpu.memory_space<vmem>>, %arg12: memref<32x128xf32, #tpu.memory_space<vmem>>, %arg13: memref<1x128xf32, #tpu.memory_space<vmem>>, %arg14: memref<16x128xf32, #tpu.memory_space<vmem>>, %arg15: memref<16x128xf32, #tpu.memory_space<vmem>>, %arg16: memref<16x128xf32, #tpu.memory_space<vmem>>, %arg17: memref<16x128xf32, #tpu.memory_space<vmem>>, %arg18: memref<16x16xf32, #tpu.memory_space<vmem>>) attributes {dimension_semantics = [], scalar_prefetch = 0 : i64, scratch_operands = 0 : i64, tpu.core_type = #tpu.core_type<tc>} {
    %c0 = arith.constant 0 : index
    %c0_0 = arith.constant 0 : index
    %0 = vector.load %arg0[%c0, %c0_0] : memref<16x128xf32, #tpu.memory_space<vmem>>, vector<16x128xf32>
    %1 = arith.truncf %0 : vector<16x128xf32> to vector<16x128xbf16>
    %c0_1 = arith.constant 0 : index
    %c0_2 = arith.constant 0 : index
    %2 = vector.load %arg1[%c0_1, %c0_2] : memref<16x128xf32, #tpu.memory_space<vmem>>, vector<16x128xf32>
    %3 = arith.truncf %2 : vector<16x128xf32> to vector<16x128xbf16>
    %c0_3 = arith.constant 0 : index
    %c0_4 = arith.constant 0 : index
    %4 = vector.load %arg2[%c0_3, %c0_4] : memref<128x128xf32, #tpu.memory_space<vmem>>, vector<128x128xf32>
    %5 = arith.truncf %4 : vector<128x128xf32> to vector<128x128xbf16>
    %cst = arith.constant dense<0.000000e+00> : vector<16x128xf32>
    %6 = tpu.matmul %1, %5, %cst {dimension_numbers = #tpu.dot_dimension_numbers<[1], [0], [0], [1], [0, 0, 1, 1], [], []>} : vector<16x128xbf16>, vector<128x128xbf16>, vector<16x128xf32> -> vector<16x128xf32>
    %c0_5 = arith.constant 0 : index
    %c0_6 = arith.constant 0 : index
    %7 = vector.load %arg4[%c0_5, %c0_6] : memref<1x128xf32, #tpu.memory_space<vmem>>, vector<1x128xf32>
    %8 = vector.broadcast %7 : vector<1x128xf32> to vector<16x128xf32>
    %9 = arith.mulf %6, %8 : vector<16x128xf32>
    %cst_7 = arith.constant dense<0.000000e+00> : vector<16x128xf32>
    %10 = tpu.matmul %3, %5, %cst_7 {dimension_numbers = #tpu.dot_dimension_numbers<[1], [1], [0], [0], [0, 0, 1, 0], [], []>} : vector<16x128xbf16>, vector<128x128xbf16>, vector<16x128xf32> -> vector<16x128xf32>
    %c0_8 = arith.constant 0 : index
    %c0_9 = arith.constant 0 : index
    %11 = vector.load %arg3[%c0_8, %c0_9] : memref<1x128xf32, #tpu.memory_space<vmem>>, vector<1x128xf32>
    %12 = vector.broadcast %11 : vector<1x128xf32> to vector<16x128xf32>
    %13 = arith.mulf %10, %12 : vector<16x128xf32>
    %c0_10 = arith.constant 0 : index
    %c0_11 = arith.constant 0 : index
    %14 = vector.load %arg14[%c0_10, %c0_11] : memref<16x128xf32, #tpu.memory_space<vmem>>, vector<16x128xf32>
    tpu.vector_store %arg14[%c0_10, %c0_11], %9 {strides = array<i32>} : memref<16x128xf32, #tpu.memory_space<vmem>>, vector<16x128xf32>,
    %c0_12 = arith.constant 0 : index
    %c0_13 = arith.constant 0 : index
    %15 = vector.load %arg15[%c0_12, %c0_13] : memref<16x128xf32, #tpu.memory_space<vmem>>, vector<16x128xf32>
    tpu.vector_store %arg15[%c0_12, %c0_13], %13 {strides = array<i32>} : memref<16x128xf32, #tpu.memory_space<vmem>>, vector<16x128xf32>,
    %c0_14 = arith.constant 0 : index
    %c0_15 = arith.constant 0 : index
    %16 = vector.load %arg5[%c0_14, %c0_15] : memref<128x64xf32, #tpu.memory_space<vmem>>, vector<128x64xf32>
    %17 = arith.truncf %16 : vector<128x64xf32> to vector<128x64xbf16>
    %c0_16 = arith.constant 0 : index
    %c0_17 = arith.constant 0 : index
    %18 = vector.load %arg6[%c0_16, %c0_17] : memref<128x64xf32, #tpu.memory_space<vmem>>, vector<128x64xf32>
    %19 = arith.truncf %18 : vector<128x64xf32> to vector<128x64xbf16>
    %c0_18 = arith.constant 0 : index
    %c0_19 = arith.constant 0 : index
    %20 = vector.load %arg7[%c0_18, %c0_19] : memref<1x64xf32, #tpu.memory_space<vmem>>, vector<1x64xf32>
    %cst_20 = arith.constant dense<0.000000e+00> : vector<16x64xf32>
    %21 = tpu.matmul %1, %17, %cst_20 {dimension_numbers = #tpu.dot_dimension_numbers<[1], [0], [0], [1], [0, 0, 1, 1], [], []>} : vector<16x128xbf16>, vector<128x64xbf16>, vector<16x64xf32> -> vector<16x64xf32>
    %22 = arith.truncf %9 : vector<16x128xf32> to vector<16x128xbf16>
    %cst_21 = arith.constant dense<0.000000e+00> : vector<16x64xf32>
    %23 = tpu.matmul %22, %19, %cst_21 {dimension_numbers = #tpu.dot_dimension_numbers<[1], [0], [0], [1], [0, 0, 1, 1], [], []>} : vector<16x128xbf16>, vector<128x64xbf16>, vector<16x64xf32> -> vector<16x64xf32>
    %24 = arith.addf %21, %23 : vector<16x64xf32>
    %25 = vector.broadcast %20 : vector<1x64xf32> to vector<16x64xf32>
    %26 = arith.addf %24, %25 : vector<16x64xf32>
    %27 = arith.truncf %13 : vector<16x128xf32> to vector<16x128xbf16>
    %cst_22 = arith.constant dense<0.000000e+00> : vector<16x64xf32>
    %28 = tpu.matmul %27, %17, %cst_22 {dimension_numbers = #tpu.dot_dimension_numbers<[1], [0], [0], [1], [0, 0, 1, 1], [], []>} : vector<16x128xbf16>, vector<128x64xbf16>, vector<16x64xf32> -> vector<16x64xf32>
    %cst_23 = arith.constant dense<0.000000e+00> : vector<16x64xf32>
    %29 = tpu.matmul %3, %19, %cst_23 {dimension_numbers = #tpu.dot_dimension_numbers<[1], [0], [0], [1], [0, 0, 1, 1], [], []>} : vector<16x128xbf16>, vector<128x64xbf16>, vector<16x64xf32> -> vector<16x64xf32>
    %30 = arith.addf %28, %29 : vector<16x64xf32>
    %31 = vector.broadcast %20 : vector<1x64xf32> to vector<16x64xf32>
    %32 = arith.addf %30, %31 : vector<16x64xf32>
    %cst_24 = arith.constant 0.000000e+00 : f32
    %33 = vector.broadcast %cst_24 : f32 to vector<16x64xf32>
    %34 = arith.maximumf %26, %33 : vector<16x64xf32>
    %cst_25 = arith.constant 0.000000e+00 : f32
    %35 = vector.broadcast %cst_25 : f32 to vector<16x64xf32>
    %36 = arith.maximumf %32, %35 : vector<16x64xf32>
    %c0_26 = arith.constant 0 : index
    %c0_27 = arith.constant 0 : index
    %37 = vector.load %arg8[%c0_26, %c0_27] : memref<64x32xf32, #tpu.memory_space<vmem>>, vector<64x32xf32>
    %38 = arith.truncf %37 : vector<64x32xf32> to vector<64x32xbf16>
    %c0_28 = arith.constant 0 : index
    %c0_29 = arith.constant 0 : index
    %39 = vector.load %arg9[%c0_28, %c0_29] : memref<1x32xf32, #tpu.memory_space<vmem>>, vector<1x32xf32>
    %40 = arith.truncf %34 : vector<16x64xf32> to vector<16x64xbf16>
    %cst_30 = arith.constant dense<0.000000e+00> : vector<16x32xf32>
    %41 = tpu.matmul %40, %38, %cst_30 {dimension_numbers = #tpu.dot_dimension_numbers<[1], [0], [0], [1], [0, 0, 1, 1], [], []>} : vector<16x64xbf16>, vector<64x32xbf16>, vector<16x32xf32> -> vector<16x32xf32>
    %42 = vector.broadcast %39 : vector<1x32xf32> to vector<16x32xf32>
    %43 = arith.addf %41, %42 : vector<16x32xf32>
    %cst_31 = arith.constant 0.000000e+00 : f32
    %44 = vector.broadcast %cst_31 : f32 to vector<16x32xf32>
    %45 = arith.maximumf %43, %44 : vector<16x32xf32>
    %46 = arith.truncf %36 : vector<16x64xf32> to vector<16x64xbf16>
    %cst_32 = arith.constant dense<0.000000e+00> : vector<16x32xf32>
    %47 = tpu.matmul %46, %38, %cst_32 {dimension_numbers = #tpu.dot_dimension_numbers<[1], [0], [0], [1], [0, 0, 1, 1], [], []>} : vector<16x64xbf16>, vector<64x32xbf16>, vector<16x32xf32> -> vector<16x32xf32>
    %48 = vector.broadcast %39 : vector<1x32xf32> to vector<16x32xf32>
    %49 = arith.addf %47, %48 : vector<16x32xf32>
    %cst_33 = arith.constant 0.000000e+00 : f32
    %50 = vector.broadcast %cst_33 : f32 to vector<16x32xf32>
    %51 = arith.maximumf %49, %50 : vector<16x32xf32>
    %52 = arith.truncf %45 : vector<16x32xf32> to vector<16x32xbf16>
    %c0_34 = arith.constant 0 : index
    %c0_35 = arith.constant 0 : index
    %53 = vector.load %arg10[%c0_34, %c0_35] : memref<32x128xf32, #tpu.memory_space<vmem>>, vector<32x128xf32>
    %54 = arith.truncf %53 : vector<32x128xf32> to vector<32x128xbf16>
    %cst_36 = arith.constant dense<0.000000e+00> : vector<16x128xf32>
    %55 = tpu.matmul %52, %54, %cst_36 {dimension_numbers = #tpu.dot_dimension_numbers<[1], [0], [0], [1], [0, 0, 1, 1], [], []>} : vector<16x32xbf16>, vector<32x128xbf16>, vector<16x128xf32> -> vector<16x128xf32>
    %c0_37 = arith.constant 0 : index
    %c0_38 = arith.constant 0 : index
    %56 = vector.load %arg11[%c0_37, %c0_38] : memref<1x128xf32, #tpu.memory_space<vmem>>, vector<1x128xf32>
    %57 = vector.broadcast %56 : vector<1x128xf32> to vector<16x128xf32>
    %58 = arith.addf %55, %57 : vector<16x128xf32>
    %c0_39 = arith.constant 0 : index
    %c0_40 = arith.constant 0 : index
    %59 = vector.load %arg16[%c0_39, %c0_40] : memref<16x128xf32, #tpu.memory_space<vmem>>, vector<16x128xf32>
    tpu.vector_store %arg16[%c0_39, %c0_40], %58 {strides = array<i32>} : memref<16x128xf32, #tpu.memory_space<vmem>>, vector<16x128xf32>,
    %60 = arith.truncf %51 : vector<16x32xf32> to vector<16x32xbf16>
    %c0_41 = arith.constant 0 : index
    %c0_42 = arith.constant 0 : index
    %61 = vector.load %arg12[%c0_41, %c0_42] : memref<32x128xf32, #tpu.memory_space<vmem>>, vector<32x128xf32>
    %62 = arith.truncf %61 : vector<32x128xf32> to vector<32x128xbf16>
    %cst_43 = arith.constant dense<0.000000e+00> : vector<16x128xf32>
    %63 = tpu.matmul %60, %62, %cst_43 {dimension_numbers = #tpu.dot_dimension_numbers<[1], [0], [0], [1], [0, 0, 1, 1], [], []>} : vector<16x32xbf16>, vector<32x128xbf16>, vector<16x128xf32> -> vector<16x128xf32>
    %c0_44 = arith.constant 0 : index
    %c0_45 = arith.constant 0 : index
    %64 = vector.load %arg13[%c0_44, %c0_45] : memref<1x128xf32, #tpu.memory_space<vmem>>, vector<1x128xf32>
    %65 = vector.broadcast %64 : vector<1x128xf32> to vector<16x128xf32>
    %66 = arith.addf %63, %65 : vector<16x128xf32>
    %c0_46 = arith.constant 0 : index
    %c0_47 = arith.constant 0 : index
    %67 = vector.load %arg17[%c0_46, %c0_47] : memref<16x128xf32, #tpu.memory_space<vmem>>, vector<16x128xf32>
    tpu.vector_store %arg17[%c0_46, %c0_47], %66 {strides = array<i32>} : memref<16x128xf32, #tpu.memory_space<vmem>>, vector<16x128xf32>,
    %cst_48 = arith.constant dense<0.000000e+00> : vector<16x16xf32>
    %68 = tpu.matmul %45, %51, %cst_48 {dimension_numbers = #tpu.dot_dimension_numbers<[1], [1], [0], [0], [0, 0, 1, 0], [], []>} : vector<16x32xf32>, vector<16x32xf32>, vector<16x16xf32> -> vector<16x16xf32>
    %69 = arith.mulf %45, %45 : vector<16x32xf32>
    %cst_49 = arith.constant dense<0.000000e+00> : vector<16xf32>
    %70 = vector.multi_reduction <add>, %69, %cst_49 [1] : vector<16x32xf32> to vector<16xf32>
    %71 = vector.shape_cast %70 : vector<16xf32> to vector<16x1xf32>
    %72 = arith.mulf %51, %51 : vector<16x32xf32>
    %cst_50 = arith.constant 1.000000e+00 : f32
    %73 = vector.broadcast %cst_50 : f32 to vector<1x32xf32>
    %cst_51 = arith.constant dense<0.000000e+00> : vector<1x16xf32>
    %74 = tpu.matmul %73, %72, %cst_51 {dimension_numbers = #tpu.dot_dimension_numbers<[1], [1], [0], [0], [0, 0, 1, 0], [], []>} : vector<1x32xf32>, vector<16x32xf32>, vector<1x16xf32> -> vector<1x16xf32>
    %75 = vector.broadcast %71 : vector<16x1xf32> to vector<16x16xf32>
    %76 = vector.broadcast %74 : vector<1x16xf32> to vector<16x16xf32>
    %77 = arith.addf %75, %76 : vector<16x16xf32>
    %cst_52 = arith.constant 2.000000e+00 : f32
    %78 = vector.broadcast %cst_52 : f32 to vector<16x16xf32>
    %79 = arith.mulf %78, %68 : vector<16x16xf32>
    %80 = arith.subf %77, %79 : vector<16x16xf32>
    %c0_53 = arith.constant 0 : index
    %c0_54 = arith.constant 0 : index
    %81 = vector.load %arg18[%c0_53, %c0_54] : memref<16x16xf32, #tpu.memory_space<vmem>>, vector<16x16xf32>
    tpu.vector_store %arg18[%c0_53, %c0_54], %80 {strides = array<i32>} : memref<16x16xf32, #tpu.memory_space<vmem>>, vector<16x16xf32>,
    return
  }
}

</mosaic_0001>

<bundles_post_ra>
// kernel: tpu_custom_call.1
= control target key start
LH: loop header
LB: loop body
LE: loop exit
PB: predicated region body
PF: predicated region fallthrough
CT: control target
= control target key end

     0   :  { %s1826_s0 = inlined_call_operand.vmem [shape: f32[16,128], index: 0, kind: input, shape index: {}]   ;;  %s1827_s1 = inlined_call_operand.vmem [shape: f32[16,128], index: 1, kind: input, shape index: {}]   ;;  %s1828_s2 = inlined_call_operand.vmem [shape: f32[128,128], index: 2, kind: input, shape index: {}]   ;;  %s1829_s3 = inlined_call_operand.vmem [shape: f32[1,128], index: 3, kind: input, shape index: {}]   ;;  %s1830_s4 = inlined_call_operand.vmem [shape: f32[1,128], index: 4, kind: input, shape index: {}]   ;;  %s1831_s5 = inlined_call_operand.vmem [shape: f32[128,64], index: 5, kind: input, shape index: {}]   ;;  %s1832_s6 = inlined_call_operand.vmem [shape: f32[128,64], index: 6, kind: input, shape index: {}]   ;;  %s1833_s7 = inlined_call_operand.vmem [shape: f32[1,64], index: 7, kind: input, shape index: {}]   ;;  %s1834_s8 = inlined_call_operand.vmem [shape: f32[64,32], index: 8, kind: input, shape index: {}]   ;;  %s1835_s9 = inlined_call_operand.vmem [shape: f32[1,32], index: 9, kind: input, shape index: {}]   ;;  %s1836_s10 = inlined_call_operand.vmem [shape: f32[32,128], index: 10, kind: input, shape index: {}]   ;;  %s1837_s11 = inlined_call_operand.vmem [shape: f32[1,128], index: 11, kind: input, shape index: {}]   ;;  %s1838_s12 = inlined_call_operand.vmem [shape: f32[32,128], index: 12, kind: input, shape index: {}]   ;;  %s1839_s13 = inlined_call_operand.vmem [shape: f32[1,128], index: 13, kind: input, shape index: {}]   ;;  %s1840_s14 = inlined_call_operand.hbm [shape: f32[16,128], index: 14, kind: output, shape index: {0}]   ;;  %s1841_s15 = inlined_call_operand.hbm [shape: f32[16,128], index: 15, kind: output, shape index: {1}]   ;;  %s1842_s16 = inlined_call_operand.hbm [shape: f32[16,128], index: 16, kind: output, shape index: {2}]   ;;  %s1843_s17 = inlined_call_operand.hbm [shape: f32[16,128], index: 17, kind: output, shape index: {3}]   ;;  %s1844_s18 = inlined_call_operand.hbm [shape: f32[16,16], index: 18, kind: output, shape index: {4}]  }
   0x1   :  { %1848 = sst [smem:[#allocation13_spill]] %s1826_s0 }
   0x2   :  { %1849 = sst [smem:[#allocation14_spill]] %s1827_s1 }
   0x3   :  { %1850 = sst [smem:[#allocation15_spill]] %s1828_s2 }
   0x4   :  { %24 = vsyncpa [#allocation3], 0 }
   0x5   :  { %25 = vsyncpa [#allocation5], 0  ;;  %s1851_s29 = sld [smem:[#allocation15_spill]]  ;;  %v1326_v3 = vmov 0.0   ;;  %vm1327_vm0 = vmmov 0  }
   0x6   :  { %1015 = vmatprep.subr.bf16.mxu0 %v1326_v3  ;;  %1035 = vmatprep.subr.bf16.mxu1 %v1326_v3 }
   0x7   :  { %1031 = vmatprep.mubr.msk.bf16.mxu0 %vm1327_vm0, %v1326_v3  ;;  %1051 = vmatprep.mubr.msk.bf16.mxu1 %vm1327_vm0, %v1326_v3 }
   0xb   :  { %v62_v0 = vld [vmem:[%s1851_s29] sm:$0xff]  ;;  %v63_v1 = vld [vmem:[%s1851_s29 + $0x8] sm:$0xff]  ;;  %v64_v2 = vld [vmem:[%s1851_s29 + $0x10] sm:$0xff] }
   0xc   :  { %v78_v4 = vpack.c.bf16 %v63_v1, %v62_v0  ;;  %v65_v5 = vld [vmem:[%s1851_s29 + $0x18] sm:$0xff]  ;;  %v66_v7 = vld [vmem:[%s1851_s29 + $0x20] sm:$0xff]  ;;  %v67_v8 = vld [vmem:[%s1851_s29 + $0x28] sm:$0xff] }
   0xd   :  { %v79_v6 = vpack.c.bf16 %v65_v5, %v64_v2  ;;  %v80_v9 = vpack.c.bf16 %v67_v8, %v66_v7  ;;  %v68_v10 = vld [vmem:[%s1851_s29 + $0x30] sm:$0xff]  ;;  %v69_v11 = vld [vmem:[%s1851_s29 + $0x38] sm:$0xff] }
   0xe   :  { %1016 = vmatpush3.bf16.msra.mxu0 %v78_v4  ;;  %1036 = vmatpush3.bf16.xpose.msra.mxu1 %v78_v4  ;;  %v81_v12 = vpack.c.bf16 %v69_v11, %v68_v10 }
   0xf   :  { %1017 = vmatprep.subr.bf16.mxu0 %v1326_v3  ;;  %1037 = vmatprep.subr.bf16.mxu1 %v1326_v3 }
  0x12   :  { %1018 = vmatpush3.bf16.msra.mxu0 %v79_v6 }
  0x13   :  { %1019 = vmatprep.subr.bf16.mxu0 %v1326_v3 }
  0x16   :  { %1020 = vmatpush3.bf16.msra.mxu0 %v80_v9  ;;  %1038 = vmatpush3.bf16.xpose.msra.mxu1 %v79_v6 }
  0x17   :  { %26 = vsyncpa [#allocation8], 0  ;;  %1021 = vmatprep.subr.bf16.mxu0 %v1326_v3  ;;  %v70_v13 = vld [vmem:[%s1851_s29 + $0x40] sm:$0xff]  ;;  %v71_v14 = vld [vmem:[%s1851_s29 + $0x48] sm:$0xff]  ;;  %1039 = vmatprep.subr.bf16.mxu1 %v1326_v3  ;;  %s1852_s20 = sld [smem:[#allocation13_spill]]  ;;  %s1853_s2 = sld [smem:[#allocation14_spill]] }
  0x18   :  { %v82_v15 = vpack.c.bf16 %v71_v14, %v70_v13  ;;  %v72_v16 = vld [vmem:[%s1851_s29 + $0x50] sm:$0xff]  ;;  %v73_v17 = vld [vmem:[%s1851_s29 + $0x58] sm:$0xff]  ;;  %v74_v19 = vld [vmem:[%s1851_s29 + $0x60] sm:$0xff]  ;;  %vm439_vm1 = vcmask 523264   ;;  %vm547_vm2 = vcmask 261120  }
  0x19   :  { %v83_v18 = vpack.c.bf16 %v73_v17, %v72_v16  ;;  %v75_v20 = vld [vmem:[%s1851_s29 + $0x68] sm:$0xff]  ;;  %v76_v22 = vld [vmem:[%s1851_s29 + $0x70] sm:$0xff]  ;;  %v77_v23 = vld [vmem:[%s1851_s29 + $0x78] sm:$0xff] }
  0x1a   :  { %1022 = vmatpush3.bf16.msra.mxu0 %v81_v12  ;;  %v84_v21 = vpack.c.bf16 %v75_v20, %v74_v19  ;;  %v85_v24 = vpack.c.bf16 %v77_v23, %v76_v22  ;;  %v214_v27 = vld [vmem:[%s1832_s6] sm:$0xff]  ;;  %v215_v28 = vld [vmem:[%s1832_s6 + $0x8] sm:$0xff]  ;;  %v216_v31 = vld [vmem:[%s1832_s6 + $0x10] sm:$0xff] }
  0x1b   :  { %1023 = vmatprep.subr.bf16.mxu0 %v1326_v3  ;;  %v230_v30 = vpack.c.bf16 %v215_v28, %v214_v27  ;;  %v217_v32 = vld [vmem:[%s1832_s6 + $0x18] sm:$0xff]  ;;  %v218_v34 = vld [vmem:[%s1832_s6 + $0x20] sm:$0xff]  ;;  %v219_v35 = vld [vmem:[%s1832_s6 + $0x28] sm:$0xff] }
  0x1c   :  { %v231_v33 = vpack.c.bf16 %v217_v32, %v216_v31  ;;  %v232_v36 = vpack.c.bf16 %v219_v35, %v218_v34  ;;  %v220_v37 = vld [vmem:[%s1832_s6 + $0x30] sm:$0xff]  ;;  %v221_v38 = vld [vmem:[%s1832_s6 + $0x38] sm:$0xff]  ;;  %v222_v40 = vld [vmem:[%s1832_s6 + $0x40] sm:$0xff] }
  0x1d   :  { %v56_v25 = vld [vmem:[%s1852_s20] sm:$0xff]  ;;  %v57_v26 = vld [vmem:[%s1852_s20 + $0x8] sm:$0xff]  ;;  %v233_v39 = vpack.c.bf16 %v221_v38, %v220_v37  ;;  %v224_v43 = vld [vmem:[%s1832_s6 + $0x50] sm:$0xff] }
  0x1e   :  { %1024 = vmatpush3.bf16.msra.mxu0 %v82_v15  ;;  %1040 = vmatpush3.bf16.xpose.msra.mxu1 %v80_v9  ;;  %v1509_v29 = vpack.c.bf16 %v57_v26, %v56_v25  ;;  %v223_v41 = vld [vmem:[%s1832_s6 + $0x48] sm:$0xff]  ;;  %v225_v44 = vld [vmem:[%s1832_s6 + $0x58] sm:$0xff]  ;;  %v226_v46 = vld [vmem:[%s1832_s6 + $0x60] sm:$0xff] }
  0x1f   :  { %1025 = vmatprep.subr.bf16.mxu0 %v1326_v3  ;;  %1041 = vmatprep.subr.bf16.mxu1 %v1326_v3  ;;  %v234_v42 = vpack.c.bf16 %v223_v41, %v222_v40  ;;  %v235_v45 = vpack.c.bf16 %v225_v44, %v224_v43  ;;  %v227_v47 = vld [vmem:[%s1832_s6 + $0x68] sm:$0xff]  ;;  %v59_v49 = vld [vmem:[%s1853_s2] sm:$0xff]  ;;  %v228_v52 = vld [vmem:[%s1832_s6 + $0x70] sm:$0xff] }
  0x20   :  { %v236_v48 = vpack.c.bf16 %v227_v47, %v226_v46  ;;  %v60_v50 = vld [vmem:[%s1853_s2 + $0x8] sm:$0xff]  ;;  %v229_v53 = vld [vmem:[%s1832_s6 + $0x78] sm:$0xff]  ;;  %v921_v55 = vld [vmem:[%s1830_s4] ss:$0 sm:$0xff] }
  0x21   :  { %v61_v51 = vpack.c.bf16 %v60_v50, %v59_v49  ;;  %v237_v54 = vpack.c.bf16 %v229_v53, %v228_v52  ;;  %v190_v59 = vld [vmem:[%s1831_s5] sm:$0xff]  ;;  %v191_v60 = vld [vmem:[%s1831_s5 + $0x8] sm:$0xff]  ;;  %v192_v2 = vld [vmem:[%s1831_s5 + $0x10] sm:$0xff] }
  0x22   :  { %1026 = vmatpush3.bf16.msra.mxu0 %v83_v18  ;;  %v206_v0 = vpack.c.bf16 %v191_v60, %v190_v59  ;;  %v193_v4 = vld [vmem:[%s1831_s5 + $0x18] sm:$0xff]  ;;  %v194_v6 = vld [vmem:[%s1831_s5 + $0x20] sm:$0xff]  ;;  %v195_v7 = vld [vmem:[%s1831_s5 + $0x28] sm:$0xff] }
  0x23   :  { %1027 = vmatprep.subr.bf16.mxu0 %v1326_v3  ;;  %v207_v5 = vpack.c.bf16 %v193_v4, %v192_v2  ;;  %v208_v8 = vpack.c.bf16 %v195_v7, %v194_v6  ;;  %v196_v9 = vld [vmem:[%s1831_s5 + $0x30] sm:$0xff]  ;;  %v197_v10 = vld [vmem:[%s1831_s5 + $0x38] sm:$0xff]  ;;  %v199_v13 = vld [vmem:[%s1831_s5 + $0x48] sm:$0xff] }
  0x24   :  { %v209_v11 = vpack.c.bf16 %v197_v10, %v196_v9  ;;  %v201_v16 = vld [vmem:[%s1831_s5 + $0x58] sm:$0xff]  ;;  %v203_v19 = vld [vmem:[%s1831_s5 + $0x68] sm:$0xff]  ;;  %v922_v23 = vld [vmem:[%s1829_s3] ss:$0 sm:$0xff] }
  0x25   :  { %v205_v22 = vld [vmem:[%s1831_s5 + $0x78] sm:$0xff]  ;;  %v421_v35 = vld [vmem:[%s1834_s8 + $0x10] sm:$0xff]  ;;  %v423_v38 = vld [vmem:[%s1834_s8 + $0x20] sm:$0xff] }
  0x26   :  { %1028 = vmatpush3.bf16.msra.mxu0 %v84_v21  ;;  %1042 = vmatpush3.bf16.xpose.msra.mxu1 %v81_v12  ;;  %v198_v12 = vld [vmem:[%s1831_s5 + $0x40] sm:$0xff]  ;;  %v425_v41 = vld [vmem:[%s1834_s8 + $0x30] sm:$0xff]  ;;  %vm1190_vm3 = vmpackc.low %vm547_vm2, %vm547_vm2 }
  0x27   :  { %1029 = vmatprep.subr.bf16.mxu0 %v1326_v3  ;;  %1043 = vmatprep.subr.bf16.mxu1 %v1326_v3  ;;  %v210_v14 = vpack.c.bf16 %v199_v13, %v198_v12  ;;  %v923_v52 = vld [vmem:[%s1833_s7] ss:$0 sm:$0xff]  ;;  %v535_v13 = vld [vmem:[%s1836_s10 + $0x8] sm:$0xff] }
  0x28   :  { %v534_v12 = vld [vmem:[%s1836_s10] sm:$0xff] }
  0x2a   :  { %1030 = vmatpush3.bf16.msra.mxu0 %v85_v24 }
  0x2b   :  { %1055 = vmatprep.subr.bf16.mxu0 %v1326_v3 }
  0x2d   :  { %1032 = vmatmul.mubr.bf16.vlgmr.msra.gmra.mrb[0].mxu0 %v1509_v29 }
  0x2e   :  { %1044 = vmatpush3.bf16.xpose.msra.mxu1 %v82_v15  ;;  %1056 = vmatpush3.bf16.msra.mxu0 %v230_v30  ;;  %v200_v15 = vld [vmem:[%s1831_s5 + $0x50] sm:$0xff] }
  0x2f   :  { %1045 = vmatprep.subr.bf16.mxu1 %v1326_v3  ;;  %1057 = vmatprep.subr.bf16.mxu0 %v1326_v3  ;;  %v211_v17 = vpack.c.bf16 %v201_v16, %v200_v15  ;;  %v536_v15 = vld [vmem:[%s1836_s10 + $0x10] sm:$0xff]  ;;  %v537_v16 = vld [vmem:[%s1836_s10 + $0x18] sm:$0xff] }
  0x30   :  { %1071 = vmatprep.mubr.msk.bf16.mxu0 %vm1327_vm0, %v1326_v3 }
  0x32   :  { %1058 = vmatpush3.bf16.msra.mxu0 %v231_v33 }
  0x33   :  { %1059 = vmatprep.subr.bf16.mxu0 %v1326_v3 }
  0x36   :  { %1046 = vmatpush3.bf16.xpose.msra.mxu1 %v83_v18  ;;  %1060 = vmatpush3.bf16.msra.mxu0 %v232_v36  ;;  %v202_v18 = vld [vmem:[%s1831_s5 + $0x60] sm:$0xff] }
  0x37   :  { %1047 = vmatprep.subr.bf16.mxu1 %v1326_v3  ;;  %1061 = vmatprep.subr.bf16.mxu0 %v1326_v3  ;;  %v212_v20 = vpack.c.bf16 %v203_v19, %v202_v18  ;;  %v595_v18 = vld [vmem:[%s1838_s12] sm:$0xff]  ;;  %v596_v19 = vld [vmem:[%s1838_s12 + $0x8] sm:$0xff] }
  0x3a   :  { %1062 = vmatpush3.bf16.msra.mxu0 %v233_v39 }
  0x3b   :  { %1063 = vmatprep.subr.bf16.mxu0 %v1326_v3 }
  0x3e   :  { %1048 = vmatpush3.bf16.xpose.msra.mxu1 %v84_v21  ;;  %1064 = vmatpush3.bf16.msra.mxu0 %v234_v42  ;;  %v204_v21 = vld [vmem:[%s1831_s5 + $0x70] sm:$0xff] }
  0x3f   :  { %1049 = vmatprep.subr.bf16.mxu1 %v1326_v3  ;;  %1065 = vmatprep.subr.bf16.mxu0 %v1326_v3 }
  0x42   :  { %1066 = vmatpush3.bf16.msra.mxu0 %v235_v45 }
  0x43   :  { %1067 = vmatprep.subr.bf16.mxu0 %v1326_v3 }
  0x46   :  { %1050 = vmatpush3.bf16.xpose.msra.mxu1 %v85_v24  ;;  %1068 = vmatpush3.bf16.msra.mxu0 %v236_v48  ;;  %v213_v24 = vpack.c.bf16 %v205_v22, %v204_v21  ;;  %v597_v21 = vld [vmem:[%s1838_s12 + $0x10] sm:$0xff]  ;;  %v598_v22 = vld [vmem:[%s1838_s12 + $0x18] sm:$0xff] }
  0x47   :  { %1069 = vmatprep.subr.bf16.mxu0 %v1326_v3  ;;  %1095 = vmatprep.subr.bf16.mxu1 %v1326_v3 }
  0x4a   :  { %1070 = vmatpush3.bf16.msra.mxu0 %v237_v54 }
  0x4b   :  { %1075 = vmatprep.subr.bf16.mxu0 %v1326_v3 }
  0x4d   :  { %1052 = vmatmul.mubr.bf16.vlgmr.msra.gmra.mrb[0].mxu1 %v61_v51 }
  0x4e   :  { %1096 = vmatpush3.bf16.msra.mxu1 %v230_v30  ;;  %1111 = vmatprep.mubr.msk.bf16.mxu1 %vm1327_vm0, %v1326_v3 }
  0x4f   :  { %1097 = vmatprep.subr.bf16.mxu1 %v1326_v3 }
  0x52   :  { %1098 = vmatpush3.bf16.msra.mxu1 %v231_v33  ;;  %v420_v33 = vld [vmem:[%s1834_s8 + $0x8] sm:$0xff] }
  0x53   :  { %1099 = vmatprep.subr.bf16.mxu1 %v1326_v3 }
  0x56   :  { %1100 = vmatpush3.bf16.msra.mxu1 %v232_v36  ;;  %v422_v36 = vld [vmem:[%s1834_s8 + $0x18] sm:$0xff] }
  0x57   :  { %1101 = vmatprep.subr.bf16.mxu1 %v1326_v3  ;;  %v428_v37 = vpack.c.bf16 %v422_v36, %v421_v35 }
  0x5a   :  { %1102 = vmatpush3.bf16.msra.mxu1 %v233_v39  ;;  %v424_v39 = vld [vmem:[%s1834_s8 + $0x28] sm:$0xff] }
  0x5b   :  { %1103 = vmatprep.subr.bf16.mxu1 %v1326_v3  ;;  %v429_v40 = vpack.c.bf16 %v424_v39, %v423_v38 }
  0x5e   :  { %1104 = vmatpush3.bf16.msra.mxu1 %v234_v42  ;;  %v426_v42 = vld [vmem:[%s1834_s8 + $0x38] sm:$0xff] }
  0x5f   :  { %1105 = vmatprep.subr.bf16.mxu1 %v1326_v3  ;;  %v430_v43 = vpack.c.bf16 %v426_v42, %v425_v41 }
  0x62   :  { %1106 = vmatpush3.bf16.msra.mxu1 %v235_v45 }
  0x63   :  { %1107 = vmatprep.subr.bf16.mxu1 %v1326_v3 }
  0x66   :  { %1108 = vmatpush3.bf16.msra.mxu1 %v236_v48 }
  0x67   :  { %1109 = vmatprep.subr.bf16.mxu1 %v1326_v3 }
  0x6a   :  { %1110 = vmatpush3.bf16.msra.mxu1 %v237_v54 }
  0x6b   :  { %1135 = vmatprep.subr.bf16.mxu1 %v1326_v3 }
  0x6d   :  { %1112 = vmatmul.mubr.bf16.vlgmr.msra.gmra.mrb[4].mxu1 %v61_v51 }
  0x6e   :  { %1143 = vmatprep.mubr.msk.bf16.mxu1 %vm1327_vm0, %v1326_v3 }
 0x100   :  { %v120_v56 = vpop.f32.mrb[0].mxu0 }
 0x101   :  { %v134_v57 = vmul.f32 %v921_v55, %v120_v56  ;;  %v1033_v58 = vpop.f32.mrb[1].mxu0 }
 0x102   :  { %v123_v61 = vpop.f32.mrb[2].mxu0 }
 0x103   :  { %186 = vst [vmem:[#allocation2] sm:$0xff] %v134_v57  ;;  %v135_v62 = vmul.f32 %v921_v55, %v123_v61  ;;  %v1034_v63 = vpop.f32.mrb[3].mxu0 }
 0x105   :  { %187 = vst [vmem:[#allocation2 + $0x8] sm:$0xff] %v135_v62  ;;  %v239_v1 = vpack.c.bf16 %v135_v62, %v134_v57 }
 0x107   :  { %1072 = vmatmul.mubr.bf16.vlgmr.msra.gmra.mrb[4].mxu0 %v239_v1 }
 0x108   :  { %1076 = vmatpush3.bf16.msra.mxu0 %v206_v0  ;;  %1091 = vmatprep.mubr.msk.bf16.mxu0 %vm1327_vm0, %v1326_v3 }
 0x109   :  { %1077 = vmatprep.subr.bf16.mxu0 %v1326_v3 }
 0x10c   :  { %1078 = vmatpush3.bf16.msra.mxu0 %v207_v5 }
 0x10d   :  { %1079 = vmatprep.subr.bf16.mxu0 %v1326_v3 }
 0x110   :  { %1080 = vmatpush3.bf16.msra.mxu0 %v208_v8 }
 0x111   :  { %1081 = vmatprep.subr.bf16.mxu0 %v1326_v3 }
 0x114   :  { %1082 = vmatpush3.bf16.msra.mxu0 %v209_v11 }
 0x115   :  { %1083 = vmatprep.subr.bf16.mxu0 %v1326_v3 }
 0x118   :  { %1084 = vmatpush3.bf16.msra.mxu0 %v210_v14 }
 0x119   :  { %1085 = vmatprep.subr.bf16.mxu0 %v1326_v3 }
 0x11c   :  { %1086 = vmatpush3.bf16.msra.mxu0 %v211_v17 }
 0x11d   :  { %1087 = vmatprep.subr.bf16.mxu0 %v1326_v3 }
 0x120   :  { %1088 = vmatpush3.bf16.msra.mxu0 %v212_v20  ;;  %v170_v25 = vpop.f32.mrb[0].mxu1 }
 0x121   :  { %1089 = vmatprep.subr.bf16.mxu0 %v1326_v3  ;;  %v184_v26 = vmul.f32 %v922_v23, %v170_v25  ;;  %v1053_v27 = vpop.f32.mrb[1].mxu1  ;;  %v924_v25 = vld [vmem:[%s1835_s9] ss:$0 sm:$0xff]  ;;  %s1330_s9 = smov [#allocation4]  }
 0x122   :  { %v173_v28 = vpop.f32.mrb[2].mxu1  ;;  %s860_s12 = sshll.u32 %s1330_s9, 4  ;;  %s861_s12 = int_to_ptr.vmem [resolvable:$true] %s860_s12 }
 0x123   :  { %188 = vst [vmem:[#allocation4] sm:$0xff] %v184_v26  ;;  %v185_v30 = vmul.f32 %v922_v23, %v173_v28  ;;  %v1054_v31 = vpop.f32.mrb[3].mxu1  ;;  %v600_v23 = vpack.c.bf16 %v598_v22, %v597_v21  ;;  %s1210_s25 = scalar_lea.vmem %s861_s12, 256  ;;  %p1215_p1 = scmp.lt.s32.totalorder %s861_s12, %s861_s12 }
 0x124   :  { %1090 = vmatpush3.bf16.msra.mxu0 %v213_v24  ;;  %p1211_p0 = scmp.ne.s32.totalorder %s861_s12, %s1210_s25  ;;  %p1216_p2 = scmp.lt.s32.totalorder %s1210_s25, %s1210_s25 }
 0x125   :  { %1115 = vmatprep.subr.bf16.mxu0 %v1326_v3  ;;  %189 = vst [vmem:[#allocation4 + $0x8] sm:$0xff] %v185_v30  ;;  %v330_v32 = vpack.c.bf16 %v185_v30, %v184_v26 }
 0x126   :  { %p1217_p3 = por %p1216_p2, %p1215_p1 }
 0x127   :  { %1092 = vmatmul.mubr.bf16.vlgmr.msra.gmra.mrb[8].mxu0 %v1509_v29  ;;  %v419_v29 = vld [vmem:[%s1834_s8] sm:$0xff] }
 0x128   :  { %1116 = vmatpush3.bf16.msra.mxu0 %v206_v0  ;;  %1131 = vmatprep.mubr.msk.bf16.mxu0 %vm1327_vm0, %v1326_v3  ;;  %v427_v34 = vpack.c.bf16 %v420_v33, %v419_v29  ;;  %p1218_p4 = pnand %p1217_p3, %p1211_p0 }
 0x129   :  { %1117 = vmatprep.subr.bf16.mxu0 %v1326_v3 }
 0x12a   :  { %1136 = vmatpush3.bf16.msra.mxu1 %v427_v34 }
 0x12b   :  { %1137 = vmatprep.subr.bf16.mxu1 %v1326_v3 }
 0x12c   :  { %1118 = vmatpush3.bf16.msra.mxu0 %v207_v5 }
 0x12d   :  { %1119 = vmatprep.subr.bf16.mxu0 %v1326_v3 }
 0x12e   :  { %1138 = vmatpush3.bf16.msra.mxu1 %v428_v37 }
 0x12f   :  { %1139 = vmatprep.subr.bf16.mxu1 %v1326_v3 }
 0x130   :  { %1120 = vmatpush3.bf16.msra.mxu0 %v208_v8 }
 0x131   :  { %1121 = vmatprep.subr.bf16.mxu0 %v1326_v3 }
 0x132   :  { %1140 = vmatpush3.bf16.msra.mxu1 %v429_v40 }
 0x133   :  { %1141 = vmatprep.subr.bf16.mxu1 %v1326_v3 }
 0x134   :  { %1122 = vmatpush3.bf16.msra.mxu0 %v209_v11 }
 0x135   :  { %1123 = vmatprep.subr.bf16.mxu0 %v1326_v3 }
 0x136   :  { %1142 = vmatpush3.bf16.msra.mxu1 %v430_v43 }
 0x137   :  { %1147 = vmatprep.subr.bf16.mxu1 %v1326_v3 }
 0x138   :  { %1124 = vmatpush3.bf16.msra.mxu0 %v210_v14  ;;  %v538_v14 = vpack.c.bf16 %v535_v13, %v534_v12 }
 0x139   :  { %1125 = vmatprep.subr.bf16.mxu0 %v1326_v3 }
 0x13c   :  { %1126 = vmatpush3.bf16.msra.mxu0 %v211_v17  ;;  %v539_v17 = vpack.c.bf16 %v537_v16, %v536_v15 }
 0x13d   :  { %1127 = vmatprep.subr.bf16.mxu0 %v1326_v3 }
 0x140   :  { %1128 = vmatpush3.bf16.msra.mxu0 %v212_v20  ;;  %v365_v44 = vpop.f32.mrb[4].mxu1  ;;  %v599_v20 = vpack.c.bf16 %v596_v19, %v595_v18 }
 0x141   :  { %1129 = vmatprep.subr.bf16.mxu0 %v1326_v3  ;;  %v1113_v45 = vpop.f32.mrb[5].mxu1 }
 0x142   :  { %v368_v46 = vpop.f32.mrb[6].mxu1 }
 0x143   :  { %v1114_v47 = vpop.f32.mrb[7].mxu1 }
 0x144   :  { %1130 = vmatpush3.bf16.msra.mxu0 %v213_v24  ;;  %v1328_v24 = vmov 0.0|0.0  }
 0x145   :  { %1159 = vmatprep.subr.bf16.mxu0 %v1326_v3 }
 0x147   :  { %1132 = vmatmul.mubr.bf16.vlgmr.msra.gmra.mrb[12].mxu0 %v330_v32 }
 0x148   :  { %1163 = vmatprep.mubr.msk.bf16.mxu0 %vm1327_vm0, %v1326_v3  ;;  %1160 = vmatpush3.bf16.msra.mxu0 %v538_v14 }
 0x149   :  { %1161 = vmatprep.subr.bf16.mxu0 %v1326_v3 }
 0x14c   :  { %1162 = vmatpush3.bf16.msra.mxu0 %v539_v17 }
 0x1da   :  { %v274_v48 = vpop.f32.mrb[4].mxu0 }
 0x1db   :  { %v1073_v49 = vpop.f32.mrb[5].mxu0 }
 0x1dc   :  { %v277_v50 = vpop.f32.mrb[6].mxu0 }
 0x1dd   :  { %v1074_v51 = vpop.f32.mrb[7].mxu0 }
 0x1de   :  { %v1329_v51 = vmov 1.0  }
 0x1fa   :  { %v315_v53 = vpop.f32.mrb[8].mxu0 }
 0x1fb   :  { %v316_v54 = vadd.f32 %v315_v53, %v274_v48  ;;  %v1093_v55 = vpop.f32.mrb[9].mxu0 }
 0x1fc   :  { %v318_v56 = vpop.f32.mrb[10].mxu0 }
 0x1fd   :  { %v328_v57 = vadd.f32 %v923_v52, %v316_v54  ;;  %v319_v58 = vadd.f32 %v318_v56, %v277_v50  ;;  %v1094_v59 = vpop.f32.mrb[11].mxu0 }
 0x1ff   :  { %v329_v60 = vadd.f32 %v923_v52, %v319_v58  ;;  %v415_v61 = vmax.f32 %v328_v57, 0.0 }
 0x201   :  { %v416_v62 = vmax.f32 %v329_v60, 0.0 }
 0x203   :  { %v432_v63 = vpack.c.bf16 %v416_v62, %v415_v61 }
 0x205   :  { %1144 = vmatmul.mubr.msk.bf16.vlgmr.msra.gmra.mrb[8].mxu1 %vm439_vm1, %v432_v63 }
 0x206   :  { %1148 = vmatpush3.bf16.msra.mxu1 %v427_v34  ;;  %1155 = vmatprep.mubr.msk.bf16.mxu1 %vm1327_vm0, %v1326_v3 }
 0x207   :  { %1149 = vmatprep.subr.bf16.mxu1 %v1326_v3 }
 0x20a   :  { %1150 = vmatpush3.bf16.msra.mxu1 %v428_v37 }
 0x20b   :  { %1151 = vmatprep.subr.bf16.mxu1 %v1326_v3 }
 0x20e   :  { %1152 = vmatpush3.bf16.msra.mxu1 %v429_v40 }
 0x20f   :  { %1153 = vmatprep.subr.bf16.mxu1 %v1326_v3 }
 0x212   :  { %1154 = vmatpush3.bf16.msra.mxu1 %v430_v43 }
 0x213   :  { %1167 = vmatprep.subr.bf16.mxu1 %v1326_v3 }
 0x21a   :  { %v406_v0 = vpop.f32.mrb[12].mxu0 }
 0x21b   :  { %v407_v1 = vadd.f32 %v406_v0, %v365_v44  ;;  %v1133_v2 = vpop.f32.mrb[13].mxu0 }
 0x21c   :  { %v409_v4 = vpop.f32.mrb[14].mxu0 }
 0x21d   :  { %v413_v5 = vadd.f32 %v923_v52, %v407_v1  ;;  %v410_v6 = vadd.f32 %v409_v4, %v368_v46  ;;  %v1134_v7 = vpop.f32.mrb[15].mxu0 }
 0x21f   :  { %v414_v8 = vadd.f32 %v923_v52, %v410_v6  ;;  %v417_v9 = vmax.f32 %v413_v5, 0.0 }
 0x221   :  { %v418_v10 = vmax.f32 %v414_v8, 0.0 }
 0x223   :  { %v486_v11 = vpack.c.bf16 %v418_v10, %v417_v9 }
 0x225   :  { %1156 = vmatmul.mubr.msk.bf16.vlgmr.msra.gmra.mrb[12].mxu1 %vm439_vm1, %v486_v11 }
 0x226   :  { %1171 = vmatprep.mubr.msk.bf16.mxu1 %vm1327_vm0, %v1326_v3  ;;  %1168 = vmatpush3.bf16.msra.mxu1 %v599_v20 }
 0x227   :  { %1169 = vmatprep.subr.bf16.mxu1 %v1326_v3 }
 0x22a   :  { %1170 = vmatpush3.bf16.msra.mxu1 %v600_v23 }
 0x22b   :  { %1195 = vmatprep.subr.bf16.mxu1 %v1328_v24 }
 0x2d8   :  { %v477_v26 = vpop.f32.mrb[8].mxu1 }
 0x2d9   :  { %v478_v27 = vadd.f32 %v924_v25, %v477_v26  ;;  %v1145_v28 = vpop.f32.mrb[9].mxu1 }
 0x2da   :  { %v480_v30 = vpop.f32.mrb[10].mxu1 }
 0x2db   :  { %v484_v31 = vmax.f32 %v478_v27, 0.0  ;;  %v481_v32 = vadd.f32 %v924_v25, %v480_v30  ;;  %v1146_v29 = vpop.f32.mrb[11].mxu1 }
 0x2dd   :  { %v485_v33 = vmax.f32 %v481_v32, 0.0  ;;  %v741_v34 = vmul.f32 %v484_v31, %v484_v31 }
 0x2df   :  { %v533_v35 = vpack.c.bf16 %v485_v33, %v484_v31  ;;  %v743_v36 = vsel %vm547_vm2, %v741_v34, 0.0  ;;  %v742_v37 = vmul.f32 %v485_v33, %v485_v33 }
 0x2e0   :  { %744 = vadd.xlane.f32.xlu0 %v743_v36 }
 0x2e1   :  { %1164 = vmatmul.mubr.msk.bf16.vlgmr.msra.gmra.mrb[16].mxu0 %vm547_vm2, %v533_v35  ;;  %v746_v38 = vsel %vm547_vm2, %v742_v37, 0.0 }
 0x2e2   :  { %1179 = vmatprep.mubr.msk.f32.mxu0 %vm547_vm2, %v484_v31 }
 0x2e4   :  { %747 = vadd.xlane.f32.xlu0 %v746_v38 }
 0x2f8   :  { %v524_v39 = vpop.f32.mrb[12].mxu1 }
 0x2f9   :  { %v525_v40 = vadd.f32 %v924_v25, %v524_v39  ;;  %v1157_v41 = vpop.f32.mrb[13].mxu1 }
 0x2fa   :  { %v527_v42 = vpop.f32.mrb[14].mxu1 }
 0x2fb   :  { %v531_v43 = vmax.f32 %v525_v40, 0.0  ;;  %v528_v44 = vadd.f32 %v924_v25, %v527_v42  ;;  %v1158_v45 = vpop.f32.mrb[15].mxu1 }
 0x2fd   :  { %v532_v46 = vmax.f32 %v528_v44, 0.0  ;;  %v749_v47 = vmul.f32 %v531_v43, %v531_v43 }
 0x2ff   :  { %v594_v48 = vpack.c.bf16 %v532_v46, %v531_v43  ;;  %v750_v49 = vmul.f32 %v532_v46, %v532_v46 }
 0x301   :  { %v1196_v50 = vpack.c.bf16 %v750_v49, %v749_v47  ;;  %1172 = vmatmul.mubr.msk.bf16.vlgmr.msra.gmra.mrb[16].mxu1 %vm547_vm2, %v594_v48  ;;  %1191 = vmatprep.subr.msk.bf16.mxu0 %vm1190_vm3, %v594_v48 }
 0x302   :  { %1194 = vmatpush3.bf16.xpose.msk.msra.mxu0 %vm1190_vm3, %v594_v48  ;;  %1186 = vmatprep.mubr.msk.f32.mxu1 %vm1327_vm0, %v1326_v3 }
 0x303   :  { %1198 = vmatpush3.bf16.xpose.msk.msra.mxu1 %vm1190_vm3, %v1196_v50 }
 0x309   :  { %1180 = vmatmul.mubr.msk.f32.vlgmr.msra.gmra.mrb[20].mxu0 %vm547_vm2, %v485_v33 }
 0x30a   :  { %1187 = vmatmul.mubr.msk.f32.vlgmr.msra.gmra.mrb[20].mxu1 %vm547_vm2, %v1329_v51 }
 0x30b   :  { %1221 = shalt.err (!%p1218_p4)
}
 0x30c   :  { %s1222_s28 = scalar_lea.hbm %s1841_s15, 256 }
 0x30d   :  { %p1223_p5 = scmp.ne.s32.totalorder %s1841_s15, %s1222_s28  ;;  %p1226_p6 = scmp.lt.u32.totalorder %s1222_s28, %s1841_s15 }
 0x30f   :  { %p1228_p7 = pnand %p1226_p6, %p1223_p5 }
 0x311   :  { %1231 = shalt.err (!%p1228_p7)
}
 0x312   :  { %s1331_s5 = smov 128   ;;  %s1332_s0 = smov 8  }
 0x313   :  { %866 = dma.vmem_to_hbm [thread:$0]  %s861_s12, 256, %s1841_s15, [#allocation5], %s1331_s5, %s1331_s5, %s1332_s0  }
 0x314   :  { %s1333_s1 = smov [#allocation2]  }
 0x315   :  { %s848_s20 = sshll.u32 %s1333_s1, 4  ;;  %s849_s20 = int_to_ptr.vmem [resolvable:$true] %s848_s20 }
 0x316   :  { %s1232_s4 = scalar_lea.vmem %s849_s20, 256  ;;  %p1237_p9 = scmp.lt.s32.totalorder %s849_s20, %s849_s20 }
 0x317   :  { %p1233_p8 = scmp.ne.s32.totalorder %s849_s20, %s1232_s4  ;;  %p1238_p10 = scmp.lt.s32.totalorder %s1232_s4, %s1232_s4 }
 0x319   :  { %p1239_p11 = por %p1238_p10, %p1237_p9 }
 0x31b   :  { %p1240_p12 = pnand %p1239_p11, %p1233_p8 }
 0x31d   :  { %1243 = shalt.err (!%p1240_p12)
}
 0x31e   :  { %s1244_s2 = scalar_lea.hbm %s1840_s14, 256 }
 0x31f   :  { %p1245_p13 = scmp.ne.s32.totalorder %s1840_s14, %s1244_s2  ;;  %p1248_p0 = scmp.lt.u32.totalorder %s1244_s2, %s1840_s14 }
 0x321   :  { %p1250_p1 = pnand %p1248_p0, %p1245_p13 }
 0x323   :  { %1253 = shalt.err (!%p1250_p1)
}
 0x324   :  { %854 = dma.vmem_to_hbm [thread:$0]  %s849_s20, 256, %s1840_s14, [#allocation3], %s1331_s5, %s1331_s5, %s1332_s0  }
 0x325   :  { %v927_v3 = vld [vmem:[%s1837_s11] ss:$0 sm:$0xff]  ;;  %s1334_s26 = smov [#allocation6]  }
 0x326   :  { %s872_s27 = sshll.u32 %s1334_s26, 4  ;;  %s873_s27 = int_to_ptr.vmem [resolvable:$true] %s872_s27 }
 0x327   :  { %s1254_s28 = scalar_lea.vmem %s873_s27, 256  ;;  %p1259_p3 = scmp.lt.s32.totalorder %s873_s27, %s873_s27 }
 0x328   :  { %p1255_p2 = scmp.ne.s32.totalorder %s873_s27, %s1254_s28  ;;  %p1260_p4 = scmp.lt.s32.totalorder %s1254_s28, %s1254_s28 }
 0x32a   :  { %p1261_p5 = por %p1260_p4, %p1259_p3 }
 0x32c   :  { %p1262_p6 = pnand %p1261_p5, %p1255_p2 }
 0x3b4   :  { %v585_v52 = vpop.f32.mrb[16].mxu0 }
 0x3b5   :  { %v586_v53 = vadd.f32 %v927_v3, %v585_v52  ;;  %v1165_v54 = vpop.f32.mrb[17].mxu0 }
 0x3b6   :  { %v588_v55 = vpop.f32.mrb[18].mxu0 }
 0x3b7   :  { %592 = vst [vmem:[#allocation6] sm:$0xff] %v586_v53  ;;  %v589_v56 = vadd.f32 %v927_v3, %v588_v55  ;;  %v1166_v57 = vpop.f32.mrb[19].mxu0 }
 0x3b9   :  { %593 = vst [vmem:[#allocation6 + $0x8] sm:$0xff] %v589_v56 }
 0x3ba   :  { %1265 = shalt.err (!%p1262_p6)
}
 0x3bb   :  { %s1266_s7 = scalar_lea.hbm %s1842_s16, 256 }
 0x3bc   :  { %p1267_p7 = scmp.ne.s32.totalorder %s1842_s16, %s1266_s7  ;;  %p1270_p8 = scmp.lt.u32.totalorder %s1266_s7, %s1842_s16 }
 0x3be   :  { %p1272_p9 = pnand %p1270_p8, %p1267_p7 }
 0x3c0   :  { %1275 = shalt.err (!%p1272_p9)
}
 0x3c1   :  { %878 = dma.vmem_to_hbm [thread:$0]  %s873_s27, 256, %s1842_s16, [#allocation5], %s1331_s5, %s1331_s5, %s1332_s0   ;;  %v830_v59 = vlaneseq  ;;  %v745_v4 = vpop.xlane.xlu0 %744 }
 0x3c2   :  { %v929_v58 = vld [vmem:[%s1839_s13] ss:$0 sm:$0xff]  ;;  %s1335_s21 = smov [#allocation7]  }
 0x3c3   :  { %s884_s22 = sshll.u32 %s1335_s21, 4  ;;  %v831_v0 = vshrl.u32 %v830_v59, 7  ;;  %s885_s22 = int_to_ptr.vmem [resolvable:$true] %s884_s22 }
 0x3c4   :  { %s1276_s16 = scalar_lea.vmem %s885_s22, 256  ;;  %p1281_p11 = scmp.lt.s32.totalorder %s885_s22, %s885_s22 }
 0x3c5   :  { %v832_v5 = vsub.s32 0, %v831_v0  ;;  %p1277_p10 = scmp.ne.s32.totalorder %s885_s22, %s1276_s16  ;;  %p1282_p12 = scmp.lt.s32.totalorder %s1276_s16, %s1276_s16 }
 0x3c7   :  { %p1283_p13 = por %p1282_p12, %p1281_p11 }
 0x3c9   :  { %p1284_p0 = pnand %p1283_p13, %p1277_p10 }
 0x3d4   :  { %v645_v60 = vpop.f32.mrb[16].mxu1 }
 0x3d5   :  { %v646_v61 = vadd.f32 %v929_v58, %v645_v60  ;;  %v1173_v62 = vpop.f32.mrb[17].mxu1 }
 0x3d6   :  { %v648_v63 = vpop.f32.mrb[18].mxu1 }
 0x3d7   :  { %652 = vst [vmem:[#allocation7] sm:$0xff] %v646_v61  ;;  %v649_v1 = vadd.f32 %v929_v58, %v648_v63  ;;  %v1174_v2 = vpop.f32.mrb[19].mxu1 }
 0x3d9   :  { %653 = vst [vmem:[#allocation7 + $0x8] sm:$0xff] %v649_v1 }
 0x3da   :  { %1287 = shalt.err (!%p1284_p0)
}
 0x3db   :  { %s1288_s23 = scalar_lea.hbm %s1843_s17, 256 }
 0x3dc   :  { %p1289_p1 = scmp.ne.s32.totalorder %s1843_s17, %s1288_s23  ;;  %p1292_p2 = scmp.lt.u32.totalorder %s1288_s23, %s1843_s17 }
 0x3de   :  { %p1294_p3 = pnand %p1292_p2, %p1289_p1 }
 0x3e0   :  { %1297 = shalt.err (!%p1294_p3)
}
 0x3e1   :  { %890 = dma.vmem_to_hbm [thread:$0]  %s885_s22, 256, %s1843_s17, [#allocation8], %s1331_s5, %s1331_s5, %s1332_s0   ;;  %v1181_v6 = vpop.f32.mrb[20].mxu0  ;;  %v826_v8 = vpop.f32.mrb[20].mxu1  ;;  %vm840_vm4 = vcmask 130048  }
 0x3e2   :  { %v732_v7 = vpop.f32.mrb[21].mxu0  ;;  %v833_v9 = vrot.slane %v826_v8, %v832_v5  ;;  %v1188_v10 = vpop.f32.mrb[21].mxu1  ;;  %s1336_s25 = smov [#allocation9]   ;;  %v837_v12 = vmul.f32 2.0, %v1181_v6 }
 0x3e3   :  { %v748_v11 = vpop.xlane.xlu0 %747  ;;  %s896_s26 = sshll.u32 %s1336_s25, 4  ;;  %v836_v13 = vmul.f32 2.0, %v732_v7  ;;  %s897_s26 = int_to_ptr.vmem [resolvable:$true] %s896_s26 }
 0x3e4   :  { %v834_v14 = vadd.f32 %v833_v9, %v745_v4  ;;  %v835_v15 = vadd.f32 %v833_v9, %v748_v11  ;;  %s1298_s27 = scalar_lea.vmem %s897_s26, 256  ;;  %p1303_p5 = scmp.lt.s32.totalorder %s897_s26, %s897_s26 }
 0x3e5   :  { %p1299_p4 = scmp.ne.s32.totalorder %s897_s26, %s1298_s27  ;;  %p1304_p6 = scmp.lt.s32.totalorder %s1298_s27, %s1298_s27 }
 0x3e6   :  { %v838_v16 = vsub.f32 %v834_v14, %v836_v13  ;;  %v839_v17 = vsub.f32 %v835_v15, %v837_v12 }
 0x3e7   :  { %p1305_p7 = por %p1304_p6, %p1303_p5 }
 0x3e8   :  { %841 = vst.msk [vmem:[#allocation9] sm:$0xff] %vm840_vm4, %v838_v16  ;;  %842 = vst.msk [vmem:[#allocation9 + $0x8] sm:$0xff] %vm840_vm4, %v839_v17 }
 0x3e9   :  { %p1306_p8 = pnand %p1305_p7, %p1299_p4 }
 0x3eb   :  { %1309 = shalt.err (!%p1306_p8)
}
 0x3ec   :  { %s1310_s14 = scalar_lea.hbm %s1844_s18, 256 }
 0x3ed   :  { %p1311_p9 = scmp.ne.s32.totalorder %s1844_s18, %s1310_s14  ;;  %p1314_p10 = scmp.lt.u32.totalorder %s1310_s14, %s1844_s18 }
 0x3ef   :  { %p1316_p11 = pnand %p1314_p10, %p1311_p9 }
 0x3f1   :  { %1319 = shalt.err (!%p1316_p11)
}
 0x3f2   :  { %902 = dma.vmem_to_hbm [thread:$0]  %s897_s26, 256, %s1844_s18, [#allocation8], %s1331_s5, %s1331_s5, %s1332_s0  }
 0x3f3   :  { %1320 = dma.done.wait [#allocation3], 256  }
 0x3f4   :  { %1321 = vsyncadd [#allocation3], 4294967040 }
 0x3f5   :  { %1322 = dma.done.wait [#allocation5], 512  }
 0x3f6   :  { %1323 = vsyncadd [#allocation5], 4294966784 }
 0x3f7   :  { %1324 = dma.done.wait [#allocation8], 512  }
 0x3f8   :  { %1325 = vsyncadd [#allocation8], 4294966784 }
 0x3f9   :  { %918 = vsyncpa [#allocation3], 1 }
 0x3fa   :  { %919 = vsyncpa [#allocation5], 1 }
 0x3fb   :  { %920 = vsyncpa [#allocation8], 1 }

</bundles_post_ra>
